<compile_context>
chip_gen: v5e
topology: v5e:2x2
jax: 0.10.0
libtpu: 0.0.40
codegen_flags: <defaults>
</compile_context>

<pallas_src>
import functools
import math

import jax
import jax.numpy as jnp
from jax.experimental import pallas as pl
from jax.experimental.pallas import tpu as pltpu


# ----------------------------------------------------------------------------
# Pallas kernel: fused 3x3 conv (single matmul over Kpad) + bias + PReLU
# ----------------------------------------------------------------------------
def _conv3x3_prelu_kernel(x_ref, w_ref, b_ref, a_ref, o_ref, p_ref, *,
                          wp, mt, cin, kpad, n_chunks):
    # x_ref: (Cin, Lp)     bf16  whole padded, row-flattened image (resident
    #                            across the row-chunk grid axis)
    # w_ref: (Cout, Kpad)  bf16  spectral-normalized weights, tap-major cols,
    #                            zero-padded from 9*Cin to Kpad
    # b_ref: (Cout, 1)     f32   conv bias
    # a_ref: (1,)          f32   PReLU slope (SMEM)
    # o_ref: (Cout, mt)    bf16  mt = rows_per_chunk * padded_width
    # p_ref: (Kpad, mt)    bf16  VMEM scratch holding the 9 shifted tap views
    if n_chunks == 1:
        base = 0                                   # fully static slicing path
    else:
        base = pl.program_id(1) * mt               # chunk stride = tr * wp
        g = math.gcd(mt, 128)
        if g > 1:
            base = pl.multiple_of(base, g)

    t = 0
    for dy in range(3):
        for dx in range(3):
            off = dy * wp + dx                     # static tap offset
            # NOTE(v5e): if the vst slot ever saturates, these sub-8-sublane
            # stores can be grouped per-dy or lane-shifted with pltpu.roll.
            p_ref[t * cin:(t + 1) * cin, :] = x_ref[:, pl.ds(base + off, mt)]
            t += 1
    if kpad > 9 * cin:
        # Zero the K-padding rows so uninitialized VMEM (possibly NaN bit
        # patterns) never reaches the MXU; matching weight columns are zero.
        p_ref[9 * cin:, :] = jnp.zeros((kpad - 9 * cin, mt), jnp.bfloat16)

    acc = jnp.dot(w_ref[...], p_ref[...],
                  preferred_element_type=jnp.float32)          # (Cout, mt) f32
    acc = acc + b_ref[...]                                     # (Cout,1) bcast
    alpha = a_ref[0]
    o_ref[...] = jnp.where(acc >= 0.0, acc, alpha * acc).astype(o_ref.dtype)


def _conv3x3_prelu_pallas(x_flat, w_t, bias, alpha, *, wp, h, n_chunks,
                          vmem_limit):
    """x_flat: (N, Cin, Lp) bf16 -> (N, n_chunks, Cout, tr*wp) bf16."""
    n, cin, lp = x_flat.shape
    cout, kpad = w_t.shape
    tr = h // n_chunks
    mt = tr * wp
    # every tap read stays inside the (zero-)padded flat image
    assert lp % 128 == 0 and lp >= (h + 2) * wp + 2

    kernel = functools.partial(_conv3x3_prelu_kernel, wp=wp, mt=mt, cin=cin,
                               kpad=kpad, n_chunks=n_chunks)
    flops = 2 * n * n_chunks * cout * kpad * mt
    bytes_accessed = (x_flat.size * 2 + w_t.size * 2 + bias.size * 4
                      + n * n_chunks * cout * mt * 2)

    return pl.pallas_call(
        kernel,
        out_shape=jax.ShapeDtypeStruct((n, n_chunks, cout, mt), jnp.bfloat16),
        grid_spec=pltpu.PrefetchScalarGridSpec(
            num_scalar_prefetch=0,
            grid=(n, n_chunks),
            in_specs=[
                # whole image; index only depends on the sample axis, so it is
                # not re-fetched across row chunks
                pl.BlockSpec((None, cin, lp), lambda i, c: (i, 0, 0)),
                # weights / bias: constant blocks (tiny; default buffering --
                # single-buffering them would only reclaim a few KiB here)
                pl.BlockSpec((cout, kpad), lambda i, c: (0, 0)),
                pl.BlockSpec((cout, 1), lambda i, c: (0, 0)),
                pl.BlockSpec(memory_space=pltpu.MemorySpace.SMEM),
            ],
            out_specs=pl.BlockSpec((None, None, cout, mt),
                                   lambda i, c: (i, c, 0, 0)),
            scratch_shapes=[pltpu.VMEM((kpad, mt), jnp.bfloat16)],
        ),
        compiler_params=pltpu.CompilerParams(
            dimension_semantics=("parallel", "parallel"),
            vmem_limit_bytes=vmem_limit),
        cost_estimate=pl.CostEstimate(flops=flops, transcendentals=0,
                                      bytes_accessed=bytes_accessed),
    )(x_flat, w_t, bias, alpha)


# ----------------------------------------------------------------------------
# Parameters: deterministic synthetic init + spectral norm + repacking
# ----------------------------------------------------------------------------
def _spectral_normalize(w, n_iters=20):
    """Divide weight by its largest singular value (w viewed as (Cout, -1))."""
    cout = w.shape[0]
    w_mat = w.reshape(cout, -1)
    u = jax.random.normal(jax.random.PRNGKey(1), (cout,), jnp.float32)
    u = u / (jnp.linalg.norm(u) + 1e-12)

    def body(_, u):
        v = w_mat.T @ u
        v = v / (jnp.linalg.norm(v) + 1e-12)
        u = w_mat @ v
        u = u / (jnp.linalg.norm(u) + 1e-12)
        return u

    u = jax.lax.fori_loop(0, n_iters, body, u)
    v = w_mat.T @ u
    v = v / (jnp.linalg.norm(v) + 1e-12)
    sigma = u @ (w_mat @ v)
    return w / sigma


def make_params(key, n_features_last):
    c_in = n_features_last // 4
    c_out = n_features_last
    k_w, k_b = jax.random.split(key)
    fan_in = c_in * 3 * 3
    bound = 1.0 / jnp.sqrt(fan_in)
    # PyTorch conv weight layout: (Cout, Cin, kh, kw)
    w = jax.random.uniform(k_w, (c_out, c_in, 3, 3), jnp.float32, -bound, bound)
    b = jax.random.uniform(k_b, (c_out,), jnp.float32, -bound, bound)
    alpha = jnp.float32(0.25)     # nn.PReLU() default init
    return {"w": w, "b": b, "alpha": alpha}


def prepare_params(params, n_power_iters=20):
    """Spectral norm + kernel-friendly repacking, hoisted out of the forward.

    TODO(synk): torch.nn.utils.spectral_norm keeps a persistent random `u`
    and runs one power-iteration step per training forward; weights here are
    static, so sigma is computed once from a fixed-seed power iteration.
    """
    w = _spectral_normalize(params["w"], n_power_iters)      # (Cout, Cin, 3, 3)
    cout, cin = w.shape[0], w.shape[1]
    k = 9 * cin
    kpad = -(-k // 16) * 16            # bf16 sublane-pack aligned contraction
    # column packing: col = (dy*3 + dx)*Cin + ci, then zero-pad to Kpad
    w_t = jnp.transpose(w, (0, 2, 3, 1)).reshape(cout, k)
    w_t = jnp.pad(w_t, ((0, 0), (0, kpad - k)))
    return {
        "w_t": w_t.astype(jnp.bfloat16),
        "bias": params["b"].reshape(cout, 1).astype(jnp.float32),
        "alpha": jnp.asarray(params["alpha"], jnp.float32).reshape(1),
    }


# ----------------------------------------------------------------------------
# Generation-aware tiling
# ----------------------------------------------------------------------------
def _vmem_budget_bytes():
    """(per-step tile budget, vmem_limit_bytes) per TPU generation."""
    cap = 64 * 1024 * 1024
    try:
        info = pltpu.get_tpu_info()
        cap = getattr(info, "vmem_capacity_bytes", cap)
    except Exception:
        pass
    if cap <= 64 * 1024 * 1024:                    # v7x: 64 MiB per TensorCore
        return 24 * 1024 * 1024, 48 * 1024 * 1024
    return 48 * 1024 * 1024, 64 * 1024 * 1024      # v5e / v6e: 128 MiB VMEM


def _pick_n_chunks(n, h, wp, cin, cout, kpad, lp, budget_bytes):
    """Fewest row chunks whose per-step VMEM footprint fits the budget."""
    def footprint(tr):
        mt = tr * wp
        inp = 2 * cin * lp * 2                 # bf16 whole image, dbl-buffered
        out = 2 * cout * mt * 2                # bf16 output block, dbl-buffered
        patches = kpad * mt * 2                # bf16 tap scratch (single)
        weights = 2 * (cout * kpad * 2 + cout * 4)
        return inp + out + patches + weights

    nch = None
    for c in sorted(d for d in range(1, h + 1) if h % d == 0):
        if footprint(h // c) <= budget_bytes:
            nch = c
            break
    if nch is None:
        nch = h
    # v7x megacore: guarantee >=2 grid steps so both TensorCores get work
    # (costs ~0.35us extra on single-TC chips, up to 2x win on v7x).
    if n * nch < 2 and h % 2 == 0:
        nch = 2
    return nch


# ----------------------------------------------------------------------------
# Forward pass
# ----------------------------------------------------------------------------
@jax.jit
def generator_suffix_forward(x_nchw, prep):
    """x_nchw: (N, C/4, H, W) f32 -> (N, C/4, 2H, 2W) f32."""
    # TODO(synk): base.forward_no_end is an external prefix module (not defined
    # in the reference file); treated as identity.
    n, cin, h, w = x_nchw.shape
    cout, kpad = prep["w_t"].shape
    wp = w + 2
    lp = -(-((h + 2) * wp + 2) // 128) * 128
    budget, vmem_limit = _vmem_budget_bytes()
    nch = _pick_n_chunks(n, h, wp, cin, cout, kpad, lp, budget)
    tr = h // nch

    # single pad + flatten + bf16-cast pass over the (small) input; no
    # halo-row duplication / chunk materialization in HBM.
    xp = jnp.pad(x_nchw, ((0, 0), (0, 0), (1, 1), (1, 1)))     # (N,Cin,H+2,Wp)
    xf = xp.reshape(n, cin, (h + 2) * wp)
    xf = jnp.pad(xf, ((0, 0), (0, 0), (0, lp - (h + 2) * wp)))
    xf = xf.astype(jnp.bfloat16)

    # hot path: fused 9-tap conv matmul + bias + PReLU in Pallas (bf16 out)
    y = _conv3x3_prelu_pallas(xf, prep["w_t"], prep["bias"], prep["alpha"],
                              wp=wp, h=h, n_chunks=nch,
                              vmem_limit=vmem_limit)   # (N,nch,Cout,tr*wp) bf16

    # single post-kernel pass: drop junk right-edge columns, undo the row
    # chunking and apply PixelShuffle(2) with ONE transpose, cast to f32.
    cp = cout // 4
    y = y.reshape(n, nch, cp, 2, 2, tr, wp)[..., :w]    # (n,nch,cp,2,2,tr,W)
    y = jnp.transpose(y, (0, 2, 1, 5, 3, 6, 4))         # (n,cp,nch,tr,2,W,2)
    y = y.astype(jnp.float32).reshape(n, cp, 2 * h, 2 * w)

    # PReLU already applied in-kernel (single shared alpha commutes with
    # PixelShuffle).
    # TODO(synk): end[0] is an external head module (not defined in the
    # reference file); treated as identity.
    return y


# ----------------------------------------------------------------------------
# Pure-JAX reference for correctness checking
# ----------------------------------------------------------------------------
def _reference_forward(x, w_sn, b, alpha):
    y = jax.lax.conv_general_dilated(
        x, w_sn, window_strides=(1, 1), padding=((1, 1), (1, 1)),
        dimension_numbers=("NCHW", "OIHW", "NCHW"))
    y = y + b.reshape(1, -1, 1, 1)
    n, c, h, w = y.shape
    cp = c // 4
    y = y.reshape(n, cp, 2, 2, h, w)
    y = jnp.transpose(y, (0, 1, 4, 2, 5, 3)).reshape(n, cp, 2 * h, 2 * w)
    return jnp.where(y >= 0.0, y, alpha * y)


# ----------------------------------------------------------------------------
if __name__ == "__main__":
    key = jax.random.PRNGKey(0)
    k_x, k_p = jax.random.split(key)

    n_features_last = 16               # upscale conv maps 4 -> 16 channels
    n, h, w = 2, 16, 16
    x = jax.random.normal(k_x, (n, n_features_last // 4, h, w), jnp.float32)
    params = make_params(k_p, n_features_last)

    prep = prepare_params(params)      # spectral norm + packing, hoisted (once)
    out = jax.block_until_ready(generator_suffix_forward(x, prep))
    assert out.shape == (n, n_features_last // 4, 2 * h, 2 * w), out.shape
    assert bool(jnp.all(jnp.isfinite(out)))

    # correctness vs pure-JAX reference (difference = bf16 operand/output rounding)
    w_sn = _spectral_normalize(params["w"])
    ref = _reference_forward(x, w_sn, params["b"], params["alpha"])
    err = float(jnp.max(jnp.abs(out - ref)))
    assert err < 5e-2, f"max abs err {err}"
    print("KERNEL_OK")
</pallas_src>

<mosaic_0001>
module attributes {stable_mosaic.version = 11 : i64} {
  func.func @_conv3x3_prelu_kernel(%arg0: i32, %arg1: i32, %arg2: memref<1x4x384xbf16, #tpu.memory_space<vmem>>, %arg3: memref<16x48xbf16, #tpu.memory_space<vmem>>, %arg4: memref<16x1xf32, #tpu.memory_space<vmem>>, %arg5: memref<1xf32, #tpu.memory_space<smem>>, %arg6: memref<1x1x16x288xbf16, #tpu.memory_space<vmem>>, %arg7: memref<48x288xbf16, #tpu.memory_space<vmem>>) attributes {dimension_semantics = [#tpu.dimension_semantics<parallel>, #tpu.dimension_semantics<parallel>], iteration_bounds = array<i64: 2, 1>, scalar_prefetch = 0 : i64, scratch_operands = 1 : i64, tpu.core_type = #tpu.core_type<tc>, window_params = [{transform_indices = @transform_0, window_bounds = array<i64: 1, 4, 384>}, {pipeline_mode = #tpu.pipeline_mode<synchronous>, transform_indices = @transform_1, window_bounds = array<i64: 16, 48>}, {pipeline_mode = #tpu.pipeline_mode<synchronous>, transform_indices = @transform_2, window_bounds = array<i64: 16, 1>}, {transform_indices = @transform_3, window_bounds = array<i64: 1>}, {transform_indices = @transform_4, window_bounds = array<i64: 1, 1, 16, 288>}]} {
    %c0 = arith.constant 0 : index
    %c0_0 = arith.constant 0 : index
    %c0_1 = arith.constant 0 : index
    %0 = vector.load %arg2[%c0, %c0_0, %c0_1] : memref<1x4x384xbf16, #tpu.memory_space<vmem>>, vector<1x4x288xbf16>
    %1 = vector.shape_cast %0 : vector<1x4x288xbf16> to vector<4x288xbf16>
    %c0_2 = arith.constant 0 : index
    %c0_3 = arith.constant 0 : index
    %2 = vector.load %arg7[%c0_2, %c0_3] : memref<48x288xbf16, #tpu.memory_space<vmem>>, vector<4x288xbf16>
    tpu.vector_store %arg7[%c0_2, %c0_3], %1 {strides = array<i32>} : memref<48x288xbf16, #tpu.memory_space<vmem>>, vector<4x288xbf16>,
    %c0_4 = arith.constant 0 : index
    %c0_5 = arith.constant 0 : index
    %c1 = arith.constant 1 : index
    %3 = vector.load %arg2[%c0_4, %c0_5, %c1] : memref<1x4x384xbf16, #tpu.memory_space<vmem>>, vector<1x4x288xbf16>
    %4 = vector.shape_cast %3 : vector<1x4x288xbf16> to vector<4x288xbf16>
    %c4 = arith.constant 4 : index
    %c0_6 = arith.constant 0 : index
    %5 = vector.load %arg7[%c4, %c0_6] : memref<48x288xbf16, #tpu.memory_space<vmem>>, vector<4x288xbf16>
    tpu.vector_store %arg7[%c4, %c0_6], %4 {strides = array<i32>} : memref<48x288xbf16, #tpu.memory_space<vmem>>, vector<4x288xbf16>,
    %c0_7 = arith.constant 0 : index
    %c0_8 = arith.constant 0 : index
    %c2 = arith.constant 2 : index
    %6 = vector.load %arg2[%c0_7, %c0_8, %c2] : memref<1x4x384xbf16, #tpu.memory_space<vmem>>, vector<1x4x288xbf16>
    %7 = vector.shape_cast %6 : vector<1x4x288xbf16> to vector<4x288xbf16>
    %c8 = arith.constant 8 : index
    %c0_9 = arith.constant 0 : index
    %8 = vector.load %arg7[%c8, %c0_9] : memref<48x288xbf16, #tpu.memory_space<vmem>>, vector<4x288xbf16>
    tpu.vector_store %arg7[%c8, %c0_9], %7 {strides = array<i32>} : memref<48x288xbf16, #tpu.memory_space<vmem>>, vector<4x288xbf16>,
    %c0_10 = arith.constant 0 : index
    %c0_11 = arith.constant 0 : index
    %c18 = arith.constant 18 : index
    %9 = vector.load %arg2[%c0_10, %c0_11, %c18] : memref<1x4x384xbf16, #tpu.memory_space<vmem>>, vector<1x4x288xbf16>
    %10 = vector.shape_cast %9 : vector<1x4x288xbf16> to vector<4x288xbf16>
    %c12 = arith.constant 12 : index
    %c0_12 = arith.constant 0 : index
    %11 = vector.load %arg7[%c12, %c0_12] : memref<48x288xbf16, #tpu.memory_space<vmem>>, vector<4x288xbf16>
    tpu.vector_store %arg7[%c12, %c0_12], %10 {strides = array<i32>} : memref<48x288xbf16, #tpu.memory_space<vmem>>, vector<4x288xbf16>,
    %c0_13 = arith.constant 0 : index
    %c0_14 = arith.constant 0 : index
    %c19 = arith.constant 19 : index
    %12 = vector.load %arg2[%c0_13, %c0_14, %c19] : memref<1x4x384xbf16, #tpu.memory_space<vmem>>, vector<1x4x288xbf16>
    %13 = vector.shape_cast %12 : vector<1x4x288xbf16> to vector<4x288xbf16>
    %c16 = arith.constant 16 : index
    %c0_15 = arith.constant 0 : index
    %14 = vector.load %arg7[%c16, %c0_15] : memref<48x288xbf16, #tpu.memory_space<vmem>>, vector<4x288xbf16>
    tpu.vector_store %arg7[%c16, %c0_15], %13 {strides = array<i32>} : memref<48x288xbf16, #tpu.memory_space<vmem>>, vector<4x288xbf16>,
    %c0_16 = arith.constant 0 : index
    %c0_17 = arith.constant 0 : index
    %c20 = arith.constant 20 : index
    %15 = vector.load %arg2[%c0_16, %c0_17, %c20] : memref<1x4x384xbf16, #tpu.memory_space<vmem>>, vector<1x4x288xbf16>
    %16 = vector.shape_cast %15 : vector<1x4x288xbf16> to vector<4x288xbf16>
    %c20_18 = arith.constant 20 : index
    %c0_19 = arith.constant 0 : index
    %17 = vector.load %arg7[%c20_18, %c0_19] : memref<48x288xbf16, #tpu.memory_space<vmem>>, vector<4x288xbf16>
    tpu.vector_store %arg7[%c20_18, %c0_19], %16 {strides = array<i32>} : memref<48x288xbf16, #tpu.memory_space<vmem>>, vector<4x288xbf16>,
    %c0_20 = arith.constant 0 : index
    %c0_21 = arith.constant 0 : index
    %c36 = arith.constant 36 : index
    %18 = vector.load %arg2[%c0_20, %c0_21, %c36] : memref<1x4x384xbf16, #tpu.memory_space<vmem>>, vector<1x4x288xbf16>
    %19 = vector.shape_cast %18 : vector<1x4x288xbf16> to vector<4x288xbf16>
    %c24 = arith.constant 24 : index
    %c0_22 = arith.constant 0 : index
    %20 = vector.load %arg7[%c24, %c0_22] : memref<48x288xbf16, #tpu.memory_space<vmem>>, vector<4x288xbf16>
    tpu.vector_store %arg7[%c24, %c0_22], %19 {strides = array<i32>} : memref<48x288xbf16, #tpu.memory_space<vmem>>, vector<4x288xbf16>,
    %c0_23 = arith.constant 0 : index
    %c0_24 = arith.constant 0 : index
    %c37 = arith.constant 37 : index
    %21 = vector.load %arg2[%c0_23, %c0_24, %c37] : memref<1x4x384xbf16, #tpu.memory_space<vmem>>, vector<1x4x288xbf16>
    %22 = vector.shape_cast %21 : vector<1x4x288xbf16> to vector<4x288xbf16>
    %c28 = arith.constant 28 : index
    %c0_25 = arith.constant 0 : index
    %23 = vector.load %arg7[%c28, %c0_25] : memref<48x288xbf16, #tpu.memory_space<vmem>>, vector<4x288xbf16>
    tpu.vector_store %arg7[%c28, %c0_25], %22 {strides = array<i32>} : memref<48x288xbf16, #tpu.memory_space<vmem>>, vector<4x288xbf16>,
    %c0_26 = arith.constant 0 : index
    %c0_27 = arith.constant 0 : index
    %c38 = arith.constant 38 : index
    %24 = vector.load %arg2[%c0_26, %c0_27, %c38] : memref<1x4x384xbf16, #tpu.memory_space<vmem>>, vector<1x4x288xbf16>
    %25 = vector.shape_cast %24 : vector<1x4x288xbf16> to vector<4x288xbf16>
    %c32 = arith.constant 32 : index
    %c0_28 = arith.constant 0 : index
    %26 = vector.load %arg7[%c32, %c0_28] : memref<48x288xbf16, #tpu.memory_space<vmem>>, vector<4x288xbf16>
    tpu.vector_store %arg7[%c32, %c0_28], %25 {strides = array<i32>} : memref<48x288xbf16, #tpu.memory_space<vmem>>, vector<4x288xbf16>,
    %cst = arith.constant 0.000000e+00 : bf16
    %27 = vector.broadcast %cst : bf16 to vector<12x288xbf16>
    %c36_29 = arith.constant 36 : index
    %c0_30 = arith.constant 0 : index
    %28 = vector.load %arg7[%c36_29, %c0_30] : memref<48x288xbf16, #tpu.memory_space<vmem>>, vector<12x288xbf16>
    tpu.vector_store %arg7[%c36_29, %c0_30], %27 {strides = array<i32>} : memref<48x288xbf16, #tpu.memory_space<vmem>>, vector<12x288xbf16>,
    %c0_31 = arith.constant 0 : index
    %c0_32 = arith.constant 0 : index
    %29 = vector.load %arg3[%c0_31, %c0_32] : memref<16x48xbf16, #tpu.memory_space<vmem>>, vector<16x48xbf16>
    %c0_33 = arith.constant 0 : index
    %c0_34 = arith.constant 0 : index
    %30 = vector.load %arg7[%c0_33, %c0_34] : memref<48x288xbf16, #tpu.memory_space<vmem>>, vector<48x288xbf16>
    %cst_35 = arith.constant dense<0.000000e+00> : vector<16x288xf32>
    %31 = tpu.matmul %29, %30, %cst_35 {dimension_numbers = #tpu.dot_dimension_numbers<[1], [0], [0], [1], [0, 0, 1, 1], [], []>} : vector<16x48xbf16>, vector<48x288xbf16>, vector<16x288xf32> -> vector<16x288xf32>
    %c0_36 = arith.constant 0 : index
    %c0_37 = arith.constant 0 : index
    %32 = vector.load %arg4[%c0_36, %c0_37] : memref<16x1xf32, #tpu.memory_space<vmem>>, vector<16x1xf32>
    %33 = vector.broadcast %32 : vector<16x1xf32> to vector<16x288xf32>
    %34 = arith.addf %31, %33 : vector<16x288xf32>
    %c0_38 = arith.constant 0 : index
    %35 = memref.load %arg5[%c0_38] : memref<1xf32, #tpu.memory_space<smem>>
    %cst_39 = arith.constant 0.000000e+00 : f32
    %36 = vector.broadcast %cst_39 : f32 to vector<16x288xf32>
    %37 = arith.cmpf oge, %34, %36 : vector<16x288xf32>
    %38 = vector.broadcast %35 : f32 to vector<16x288xf32>
    %39 = arith.mulf %38, %34 : vector<16x288xf32>
    %40 = arith.select %37, %34, %39 : vector<16x288xi1>, vector<16x288xf32>
    %41 = arith.truncf %40 : vector<16x288xf32> to vector<16x288xbf16>
    %c0_40 = arith.constant 0 : index
    %c0_41 = arith.constant 0 : index
    %c0_42 = arith.constant 0 : index
    %c0_43 = arith.constant 0 : index
    %42 = vector.load %arg6[%c0_40, %c0_41, %c0_42, %c0_43] : memref<1x1x16x288xbf16, #tpu.memory_space<vmem>>, vector<1x1x16x288xbf16>
    %43 = vector.shape_cast %42 : vector<1x1x16x288xbf16> to vector<16x288xbf16>
    %44 = vector.shape_cast %41 : vector<16x288xbf16> to vector<1x1x16x288xbf16>
    tpu.vector_store %arg6[%c0_40, %c0_41, %c0_42, %c0_43], %44 {strides = array<i32>} : memref<1x1x16x288xbf16, #tpu.memory_space<vmem>>, vector<1x1x16x288xbf16>,
    return
  }
  func.func @transform_0(%arg0: i32, %arg1: i32) -> (i32, i32, i32) {
    %c0_i32 = arith.constant 0 : i32
    %c0_i32_0 = arith.constant 0 : i32
    %c0_i32_1 = arith.constant 0 : i32
    return %arg0, %c0_i32, %c0_i32_0 : i32, i32, i32
  }
  func.func @transform_1(%arg0: i32, %arg1: i32) -> (i32, i32) {
    %c0_i32 = arith.constant 0 : i32
    %c0_i32_0 = arith.constant 0 : i32
    %c0_i32_1 = arith.constant 0 : i32
    return %c0_i32, %c0_i32_0 : i32, i32
  }
  func.func @transform_2(%arg0: i32, %arg1: i32) -> (i32, i32) {
    %c0_i32 = arith.constant 0 : i32
    %c0_i32_0 = arith.constant 0 : i32
    %c0_i32_1 = arith.constant 0 : i32
    return %c0_i32, %c0_i32_0 : i32, i32
  }
  func.func @transform_3(%arg0: i32, %arg1: i32) -> i32 {
    %c0_i32 = arith.constant 0 : i32
    %c0_i32_0 = arith.constant 0 : i32
    return %c0_i32 : i32
  }
  func.func @transform_4(%arg0: i32, %arg1: i32) -> (i32, i32, i32, i32) {
    %c0_i32 = arith.constant 0 : i32
    %c0_i32_0 = arith.constant 0 : i32
    %c0_i32_1 = arith.constant 0 : i32
    return %arg0, %arg1, %c0_i32, %c0_i32_0 : i32, i32, i32, i32
  }
}

</mosaic_0001>

<bundles_post_ra>
// kernel: generator_suffix_forward.1
= control target key start
LH: loop header
LB: loop body
LE: loop exit
PB: predicated region body
PF: predicated region fallthrough
CT: control target
= control target key end

     0   :  { %s800_s17 = smov 0   ;;  %s802_s18 = smov 0   ;;  %s897_s0 = inlined_call_operand.vmem [shape: bf16[2,4,384], index: 0, kind: input, shape index: {}]   ;;  %s898_s1 = inlined_call_operand.vmem [shape: bf16[16,48], index: 1, kind: input, shape index: {}]   ;;  %s899_s2 = inlined_call_operand.vmem [shape: f32[16,1], index: 2, kind: input, shape index: {}]   ;;  %s900_s3 = inlined_call_operand.<no memory space> [shape: f32[1], index: 3, kind: input, shape index: {}]   ;;  %s901_s4 = inlined_call_operand.vmem [shape: bf16[2,1,16,288], index: 4, kind: output, shape index: {}]  }
   0x1   :  { %9 = sst [smem:[#allocation3]] %s900_s3  ;;  %s804_s19 = smov 0  }
   0x2 LB: > { %s27_s3 = sadd.s32 1, %s757_s18  ;;  %p643_p0 = scmp.ge.s32.totalorder %s761_s19, 1  ;;  %s761_s19 = sphi %s804_s19, %s15_s19   ;;  %s757_s18 = sphi %s802_s18, %s903_s18   ;;  %s753_s17 = sphi %s800_s17, %s902_s17  }
   0x3   : > { %p29_p1 = scmp.ge.s32.totalorder %s27_s3, 2  ;;  %p177_p2 = scmp.lt.s32.totalorder %s761_s19, 3 }
   0x5   : > { %s905_s3 = smov (%p29_p1, %s27_s3), 0  ;;  %p178_p3 = pnand %p643_p0, %p177_p2 }
   0x6   : > { %p207_p4 = scmp.lt.s32.totalorder (!%p178_p3), %s753_s17, 1  ;;  %s763_s24 = smov (!%p178_p3), 127  }
   0x7   : > { %181 = sbr.rel (%p178_p3) target bundleno = 380 (0x17c), region = 36  ;;  %s764_s25 = smov (!%p178_p3), 126  }
   0x8   : > { %s765_s26 = smov (!%p178_p3), 110   ;;  %s766_s27 = smov (!%p178_p3), 109  }
   0x9   : > { %s767_s28 = smov (!%p178_p3), 108   ;;  %s768_s29 = smov (!%p178_p3), 92  }
   0xa   : > { %s769_s30 = smov (!%p178_p3), 91   ;;  %s770_s5 = smov (!%p178_p3), 90  }
   0xb   : > { %s528_s12 = sld [smem:[#allocation3]] (!%p178_p3) }
   0xc   : > { %s907_s17 = smov (!%p207_p4, %s753_s17), 1  ;;  %vm230_vm0 = vcmask 254976   ;;  %vm253_vm1 = vcmask 257026   ;;  %v771_v27 = vmov 0   ;;  %vm246_vm2 = vcmask 1043456  }
   0xd   : > { %s701_s20 = smul.u32 6, %s907_s17  ;;  %399 = vst.msk [vmem:[#allocation2 + $0x38] sm:$0xc] %vm253_vm1, %v771_v27  ;;  %736 = vset.pattern.permute.xlu1 %v771_v27  ;;  %737 = vset.pattern.permute.xlu2 %v771_v27  ;;  %vm351_vm3 = vcmask 752640   ;;  %vm401_vm4 = vcmask 257024   ;;  %vm310_vm5 = vcmask 891904  }
   0xe   : > { %398 = vst [vmem:[#allocation2 + $0x30] sm:$0xcc] %v771_v27  ;;  %738 = vset.pattern.permute.xlu0 %v771_v27  ;;  %vm331_vm6 = vcmask 883712   ;;  %vm269_vm7 = vcmask 1031168   ;;  %vm248_vm8 = vcmask 1039360   ;;  %vm372_vm9 = vcmask 744448  }
   0xf   : > { %s824_s23 = scalar_lea.vmem %s897_s0, %s701_s20  ;;  %400 = vst [vmem:[#allocation2 + $0x3c] sm:$0xff] %v771_v27  ;;  %vm392_vm10 = vcmask 736256   ;;  %vm290_vm11 = vcmask 900096   ;;  %vm482_vm12 = vcmask 392192   ;;  %s702_s13 = smul.u32 24, %s907_s17 }
  0x10   : > { %v222_v0 = vld [vmem:[%s824_s23] sm:$0x3f]  ;;  %402 = vst.msk [vmem:[#allocation2 + $0x44] sm:$0xf] %vm401_vm4, %v771_v27 }
  0x11   : > { %224 = vst [vmem:[#allocation1] ss:$2 sm:$0xff] %v222_v0  ;;  %v232_v1 = vld [vmem:[%s824_s23] sm:$0x3f]  ;;  %s880_s16 = scalar_lea.vmem %s901_s4, %s702_s13 }
  0x12   : > { %v255_v4 = vld [vmem:[%s824_s23] sm:$0x3f] }
  0x13   : > { %v275_v7 = vld [vmem:[%s824_s23] sm:$0x3f] }
  0x14   : > { %v296_v10 = vld [vmem:[%s824_s23] sm:$0x3f] }
  0x15   : > { %v316_v13 = vld [vmem:[%s824_s23] sm:$0x3f] }
  0x16   : > { %v337_v16 = vld [vmem:[%s824_s23] sm:$0x3f] }
  0x17   : > { %v357_v19 = vld [vmem:[%s824_s23] sm:$0x3f] }
  0x18   : > { %v225_v2 = vld.sshfl [vmem:[#allocation1] sm:$0xff pattern:$0x75643120]  ;;  %v226_v3 = vld.sshfl [vmem:[#allocation1 + $0x8] sm:$0xff pattern:$0x75643120] }
  0x19   : > { %235 = vst [vmem:[#allocation1 + $0x1] ss:$2 sm:$0xff] %v232_v1  ;;  %v378_v22 = vld [vmem:[%s824_s23] sm:$0x3f] }
  0x1a   : > { %229 = vst [vmem:[#allocation2] sm:$0x33] %v225_v2  ;;  %v417_v2 = vld [vmem:[%s899_s2] sm:$0xff] }
  0x1b   : > { %231 = vst.msk [vmem:[#allocation2 + $0x8] sm:$0x3] %vm230_vm0, %v226_v3  ;;  %v418_v3 = vld [vmem:[%s899_s2 + $0x8] sm:$0xff] }
  0x20   : > { %v238_v5 = vld.sshfl [vmem:[#allocation1 + $0x8] sm:$0xff pattern:$0x75643120]  ;;  %v236_v6 = vld.sshfl [vmem:[#allocation1] sm:$0xff pattern:$0x75643120] }
  0x21   : > { %242 = vrot.lane.b32.xlu1 %v238_v5, %s763_s24  ;;  %257 = vst [vmem:[#allocation1] ss:$2 sm:$0xff] %v255_v4  ;;  %v700_v4 = vld [vmem:[#allocation2 + $0x40] sm:$0xf0] }
  0x28   : > { %v258_v8 = vld.sshfl [vmem:[#allocation1] sm:$0xff pattern:$0x75643120]  ;;  %v260_v9 = vld.sshfl [vmem:[#allocation1 + $0x8] sm:$0xff pattern:$0x75643120] }
  0x29   : > { %278 = vst [vmem:[#allocation1 + $0x1] ss:$2 sm:$0xff] %v275_v7  ;;  %264 = vrot.lane.b32.xlu2 %v260_v9, %s764_s25 }
  0x30   : > { %v279_v11 = vld.sshfl [vmem:[#allocation1] sm:$0xff pattern:$0x75643120]  ;;  %v281_v12 = vld.sshfl [vmem:[#allocation1 + $0x8] sm:$0xff pattern:$0x75643120] }
  0x31   : > { %298 = vst [vmem:[#allocation1] ss:$2 sm:$0xff] %v296_v10  ;;  %285 = vrot.lane.b32.xlu0 %v281_v12, %s765_s26 }
  0x38   : > { %v301_v14 = vld.sshfl [vmem:[#allocation1 + $0x8] sm:$0xff pattern:$0x75643120]  ;;  %v299_v15 = vld.sshfl [vmem:[#allocation1] sm:$0xff pattern:$0x75643120] }
  0x39   : > { %305 = vrot.lane.b32.xlu1 %v301_v14, %s766_s27  ;;  %319 = vst [vmem:[#allocation1 + $0x1] ss:$2 sm:$0xff] %v316_v13  ;;  %303 = vrot.lane.b32.xlu0 %v299_v15, %s766_s27 }
  0x40   : > { %v322_v17 = vld.sshfl [vmem:[#allocation1 + $0x8] sm:$0xff pattern:$0x75643120]  ;;  %v320_v18 = vld.sshfl [vmem:[#allocation1] sm:$0xff pattern:$0x75643120] }
  0x41   : > { %326 = vrot.lane.b32.xlu1 %v322_v17, %s767_s28  ;;  %339 = vst [vmem:[#allocation1] ss:$2 sm:$0xff] %v337_v16 }
  0x48   : > { %v342_v20 = vld.sshfl [vmem:[#allocation1 + $0x8] sm:$0xff pattern:$0x75643120]  ;;  %v340_v21 = vld.sshfl [vmem:[#allocation1] sm:$0xff pattern:$0x75643120] }
  0x49   : > { %324 = vrot.lane.b32.xlu1 %v320_v18, %s767_s28  ;;  %346 = vrot.lane.b32.xlu2 %v342_v20, %s768_s29  ;;  %360 = vst [vmem:[#allocation1 + $0x1] ss:$2 sm:$0xff] %v357_v19 }
  0x50   : > { %v361_v23 = vld.sshfl [vmem:[#allocation1] sm:$0xff pattern:$0x75643120]  ;;  %v363_v24 = vld.sshfl [vmem:[#allocation1 + $0x8] sm:$0xff pattern:$0x75643120] }
  0x51   : > { %240 = vrot.lane.b32.xlu1 %v236_v6, %s763_s24  ;;  %344 = vrot.lane.b32.xlu2 %v340_v21, %s768_s29  ;;  %380 = vst [vmem:[#allocation1] ss:$2 sm:$0xff] %v378_v22  ;;  %v691_v21 = vld [vmem:[%s898_s1] sm:$0xff] }
  0x52   : > { %365 = vrot.lane.b32.xlu0 %v361_v23, %s769_s30  ;;  %v699_v22 = vld [vmem:[#allocation2 + $0x38] sm:$0xf0]  ;;  %v678_v23 = vld [vmem:[#allocation2 + $0x3c] sm:$0xf0] }
  0x58   : > { %v383_v25 = vld.sshfl [vmem:[#allocation1 + $0x8] sm:$0xff pattern:$0x75643120]  ;;  %v381_v26 = vld.sshfl [vmem:[#allocation1] sm:$0xff pattern:$0x75643120] }
  0x59   : > { %367 = vrot.lane.b32.xlu2 %v363_v24, %s769_s30  ;;  %421 = vperm.xlu1 %736, %v417_v2  }
  0x5a   : > { %387 = vrot.lane.b32.xlu0 %v383_v25, %s770_s5 }
  0x61   : > { %262 = vrot.lane.b32.xlu2 %v258_v8, %s764_s25 }
  0x62   : > { %385 = vrot.lane.b32.xlu0 %v381_v26, %s770_s5 }
  0x69   : > { %426 = vperm.xlu2 %737, %v418_v3  }
  0x6a   : > { %283 = vrot.lane.b32.xlu0 %v279_v11, %s765_s26 }
  0x83   : > { %v265_v28 = vpop.permute.xlu2 %264 }
  0x84   : > { %274 = vst.msk [vmem:[#allocation2 + $0x14] sm:$0x3] %vm230_vm0, %v265_v28  ;;  %v267_v45 = vrot.slane %v265_v28, 4 }
  0x93   : > { %v243_v29 = vpop.permute.xlu1 %242 }
  0x94   : > { %254 = vst.msk [vmem:[#allocation2 + $0x8] sm:$0xc] %vm253_vm1, %v243_v29  ;;  %v245_v57 = vrot.slane %v243_v29, 4 }
  0x9b   : > { %v660_v15 = vld [vmem:[#allocation2 + $0x8] sm:$0xf] }
  0xa3   : > { %v347_v30 = vpop.permute.xlu2 %346  ;;  %v845_v31 = vpop.permute.xlu0 %285 }
  0xa4   : > { %356 = vst.msk [vmem:[#allocation2 + $0x2c] sm:$0x3] %vm230_vm0, %v347_v30  ;;  %v349_v32 = vrot.slane %v347_v30, 4  ;;  %v288_v18 = vrot.slane %v845_v31, 4 }
  0xa5   : > { %295 = vst.msk [vmem:[#allocation2 + $0x14] sm:$0xc] %vm253_vm1, %v845_v31 }
  0xab   : > { %v306_v33 = vpop.permute.xlu1 %305  ;;  %v345_v34 = vpop.permute.xlu2 %344 }
  0xac   : > { %v308_v35 = vrot.slane %v306_v33, 4  ;;  %315 = vst.msk [vmem:[#allocation2 + $0x20] sm:$0x3] %vm230_vm0, %v306_v33  ;;  %v348_v36 = vrot.slane %v345_v34, 4  ;;  %v304_v37 = vpop.permute.xlu0 %303  ;;  %v694_v16 = vld [vmem:[#allocation2 + $0x10] sm:$0xf0] }
  0xad   : > { %v307_v38 = vrot.slane %v304_v37, 4  ;;  %v661_v20 = vor.u32 %v694_v16, %v660_v15 }
  0xae   : > { %v350_v39 = vsel %vm246_vm2, %v348_v36, %v349_v32 }
  0xaf   : > { %v352_v40 = vsel %vm351_vm3, %v345_v34, %v350_v39  ;;  %v309_v41 = vsel %vm246_vm2, %v307_v38, %v308_v35 }
  0xb0   : > { %355 = vst [vmem:[#allocation2 + $0x24] sm:$0x33] %v352_v40  ;;  %v311_v42 = vsel %vm310_vm5, %v304_v37, %v309_v41 }
  0xb1   : > { %314 = vst [vmem:[#allocation2 + $0x18] sm:$0x33] %v311_v42 }
  0xb3   : > { %v327_v43 = vpop.permute.xlu1 %326  ;;  %v368_v44 = vpop.permute.xlu2 %367 }
  0xb4   : > { %336 = vst.msk [vmem:[#allocation2 + $0x20] sm:$0xc] %vm253_vm1, %v327_v43  ;;  %v329_v46 = vrot.slane %v327_v43, 4  ;;  %v370_v55 = vrot.slane %v368_v44, 4 }
  0xb5   : > { %377 = vst.msk [vmem:[#allocation2 + $0x2c] sm:$0xc] %vm253_vm1, %v368_v44  ;;  %v535_v44 = vstv %s528_s12 }
  0xbb   : > { %v325_v47 = vpop.permute.xlu1 %324  ;;  %v263_v48 = vpop.permute.xlu2 %262  ;;  %v672_v10 = vld [vmem:[#allocation2 + $0x20] sm:$0xf] }
  0xbc   : > { %v328_v49 = vrot.slane %v325_v47, 4  ;;  %v266_v50 = vrot.slane %v263_v48, 4  ;;  %v697_v11 = vld [vmem:[#allocation2 + $0x28] sm:$0xf0] }
  0xbd   : > { %v673_v14 = vor.u32 %v697_v11, %v672_v10 }
  0xbe   : > { %v330_v51 = vsel %vm246_vm2, %v328_v49, %v329_v46  ;;  %v268_v52 = vsel %vm246_vm2, %v266_v50, %v267_v45 }
  0xbf   : > { %v332_v53 = vsel %vm331_vm6, %v325_v47, %v330_v51  ;;  %v270_v54 = vsel %vm269_vm7, %v263_v48, %v268_v52 }
  0xc0   : > { %335 = vst [vmem:[#allocation2 + $0x18] sm:$0xcc] %v332_v53 }
  0xc1   : > { %273 = vst [vmem:[#allocation2 + $0xc] sm:$0x33] %v270_v54 }
  0xc3   : > { %v241_v56 = vpop.permute.xlu1 %240  ;;  %v427_v53 = vpop.permute.xlu2 %426 }
  0xc4   : > { %v244_v58 = vrot.slane %v241_v56, 4  ;;  %v366_v59 = vpop.permute.xlu0 %365 }
  0xc5   : > { %v369_v60 = vrot.slane %v366_v59, 4 }
  0xc6   : > { %v247_v61 = vsel %vm246_vm2, %v244_v58, %v245_v57 }
  0xc7   : > { %v249_v62 = vsel %vm248_vm8, %v241_v56, %v247_v61  ;;  %v371_v63 = vsel %vm246_vm2, %v369_v60, %v370_v55  ;;  %v664_v32 = vld [vmem:[#allocation2 + $0x18] sm:$0xf]  ;;  %v695_v33 = vld [vmem:[#allocation2 + $0x1c] sm:$0xf] }
  0xc8   : > { %252 = vst [vmem:[#allocation2] sm:$0xcc] %v249_v62  ;;  %v373_v0 = vsel %vm372_vm9, %v366_v59, %v371_v63 }
  0xc9   : > { %376 = vst [vmem:[#allocation2 + $0x24] sm:$0xcc] %v373_v0 }
  0xcb   : > { %v422_v42 = vpop.permute.xlu1 %421 }
  0xcc   : > { %v388_v1 = vpop.permute.xlu0 %387 }
  0xcd   : > { %397 = vst.msk [vmem:[#allocation2 + $0x38] sm:$0x3] %vm230_vm0, %v388_v1  ;;  %v390_v7 = vrot.slane %v388_v1, 4 }
  0xcf   : > { %v652_v36 = vld [vmem:[#allocation2] sm:$0xf]  ;;  %v692_v38 = vld [vmem:[#allocation2 + $0x4] sm:$0xf] }
  0xd0   : > { %v696_v30 = vld [vmem:[#allocation2 + $0x20] sm:$0xf0]  ;;  %v666_v31 = vld [vmem:[#allocation2 + $0x24] sm:$0xf0] }
  0xd1   : > { %v665_v34 = vor.u32 %v696_v30, %v664_v32  ;;  %v669_v35 = vor.u32 %v695_v33, %v666_v31 }
  0xd4   : > { %v386_v5 = vpop.permute.xlu0 %385  ;;  %v684_v6 = vld [vmem:[#allocation2 + $0x38] sm:$0xf] }
  0xd5   : > { %v389_v8 = vrot.slane %v386_v5, 4  ;;  %v685_v9 = vor.u32 %v700_v4, %v684_v6 }
  0xd7   : > { %v391_v12 = vsel %vm246_vm2, %v389_v8, %v390_v7  ;;  %519 = vmatpush.bf16.msra.mxu2 %v685_v9 }
  0xd8   : > { %v393_v13 = vsel %vm392_vm10, %v386_v5, %v391_v12 }
  0xd9   : > { %396 = vst [vmem:[#allocation2 + $0x30] sm:$0x33] %v393_v13 }
  0xdb   : > { %520 = vmatpush.bf16.msra.mxu2 %v673_v14 }
  0xdc   : > { %v284_v17 = vpop.permute.xlu0 %283 }
  0xdd   : > { %v287_v19 = vrot.slane %v284_v17, 4 }
  0xdf   : > { %v289_v24 = vsel %vm246_vm2, %v287_v19, %v288_v18  ;;  %521 = vmatpush.bf16.msra.mxu2 %v661_v20 }
  0xe0   : > { %v291_v25 = vsel %vm290_vm11, %v284_v17, %v289_v24  ;;  %v676_v26 = vld [vmem:[#allocation2 + $0x30] sm:$0xf]  ;;  %v698_v27 = vld [vmem:[#allocation2 + $0x34] sm:$0xf] }
  0xe1   : > { %294 = vst [vmem:[#allocation2 + $0xc] sm:$0xcc] %v291_v25  ;;  %v677_v28 = vor.u32 %v699_v22, %v676_v26  ;;  %v681_v29 = vor.u32 %v698_v27, %v678_v23 }
  0xe2   : > { %688 = vmatmul.msk.bf16.vlgmr.msra.gmra.mxu2 %vm482_vm12, %v691_v21 }
  0xe3   : > { %491 = vmatpush.bf16.msra.mxu0 %v677_v28  ;;  %505 = vmatpush.bf16.msra.mxu1 %v681_v29 }
  0xe7   : > { %492 = vmatpush.bf16.msra.mxu0 %v665_v34  ;;  %506 = vmatpush.bf16.msra.mxu1 %v669_v35 }
  0xe8   : > { %v693_v37 = vld [vmem:[#allocation2 + $0x8] sm:$0xf0]  ;;  %v654_v39 = vld [vmem:[#allocation2 + $0xc] sm:$0xf0] }
  0xe9   : > { %v653_v40 = vor.u32 %v693_v37, %v652_v36  ;;  %v657_v41 = vor.u32 %v692_v38, %v654_v39 }
  0xeb   : > { %493 = vmatpush.bf16.msra.mxu0 %v653_v40  ;;  %507 = vmatpush.bf16.msra.mxu1 %v657_v41 }
  0xee   : > { %686 = vmatmul.msk.bf16.vlgmr.msra.gmra.mxu0 %vm482_vm12, %v691_v21  ;;  %687 = vmatmul.msk.bf16.vlgmr.msra.gmra.mxu1 %vm482_vm12, %v691_v21 }
 0x165   : > { %v523_v43 = vpop.f32.mrf.mxu2 }
 0x166   : > { %v524_v45 = vadd.f32 %v523_v43, %v422_v42 }
 0x168   : > { %vm531_vm13 = vcmp.ge.f32.partialorder %v524_v45, 0.0  ;;  %v538_v46 = vmul.f32 %v535_v44, %v524_v45 }
 0x16a   : > { %v544_v47 = vsel %vm531_vm13, %v524_v45, %v538_v46 }
 0x16b   : > { %v549_v48 = vpack.c.bf16 %v544_v47, %v544_v47  ;;  %v495_v49 = vpop.f32.mrf.mxu0  ;;  %v509_v50 = vpop.f32.mrf.mxu1 }
 0x16c   : > { %v496_v51 = vadd.f32 %v495_v49, %v422_v42  ;;  %v510_v52 = vadd.f32 %v509_v50, %v422_v42 }
 0x16d   : > { %553 = vst.msk [vmem:[%s880_s16 + $0x8] sm:$0xf] %vm401_vm4, %v549_v48  ;;  %v525_v54 = vpop.f32.mrf.mxu2 }
 0x16e   : > { %vm529_vm14 = vcmp.ge.f32.partialorder %v496_v51, 0.0  ;;  %v536_v55 = vmul.f32 %v535_v44, %v496_v51  ;;  %vm530_vm15 = vcmp.ge.f32.partialorder %v510_v52, 0.0  ;;  %v537_v56 = vmul.f32 %v535_v44, %v510_v52 }
 0x16f   : > { %v526_v57 = vadd.f32 %v525_v54, %v427_v53 }
 0x170   : > { %v542_v58 = vsel %vm529_vm14, %v496_v51, %v536_v55  ;;  %v543_v59 = vsel %vm530_vm15, %v510_v52, %v537_v56 }
 0x171   : > { %v548_v60 = vpack.c.bf16 %v543_v59, %v542_v58  ;;  %vm534_vm0 = vcmp.ge.f32.partialorder %v526_v57, 0.0  ;;  %v541_v61 = vmul.f32 %v535_v44, %v526_v57 }
 0x173   : > { %552 = vst [vmem:[%s880_s16] sm:$0xff] %v548_v60  ;;  %v547_v62 = vsel %vm534_vm0, %v526_v57, %v541_v61  ;;  %v497_v63 = vpop.f32.mrf.mxu0  ;;  %v511_v0 = vpop.f32.mrf.mxu1 }
 0x174   : > { %v551_v1 = vpack.c.bf16 %v547_v62, %v547_v62  ;;  %v498_v2 = vadd.f32 %v497_v63, %v427_v53  ;;  %v512_v3 = vadd.f32 %v511_v0, %v427_v53 }
 0x176   : > { %555 = vst.msk [vmem:[%s880_s16 + $0x14] sm:$0xf] %vm401_vm4, %v551_v1  ;;  %vm532_vm1 = vcmp.ge.f32.partialorder %v498_v2, 0.0  ;;  %v539_v4 = vmul.f32 %v535_v44, %v498_v2  ;;  %vm533_vm2 = vcmp.ge.f32.partialorder %v512_v3, 0.0  ;;  %v540_v5 = vmul.f32 %v535_v44, %v512_v3 }
 0x178   : > { %v545_v6 = vsel %vm532_vm1, %v498_v2, %v539_v4  ;;  %v546_v7 = vsel %vm533_vm2, %v512_v3, %v540_v5 }
 0x179   : > { %v550_v8 = vpack.c.bf16 %v546_v7, %v545_v6 }
 0x17b   : > { %554 = vst [vmem:[%s880_s16 + $0xc] sm:$0xff] %v550_v8 }
 0x17c PF: > { %s15_s19 = sadd.s32 1, %s761_s19   ;;  %s902_s17 = smov %s757_s18 }
 0x17d   : > { %p12_p5 = scmp.ge.s32.totalorder %s15_s19, 4   ;;  %s903_s18 = smov %s905_s3 }
 0x17f   :  { %14 = sbr.rel (!%p12_p5) target bundleno = 2 (0x2), region = 70 }

</bundles_post_ra>
